<compile_context>
chip_gen: v6e
topology: v6e:2x2x1
jax: 0.10.0
libtpu: 0.0.40
codegen_flags: <defaults>
</compile_context>

<pallas_src>
import jax
import jax.numpy as jnp
import numpy as np
from jax.experimental import pallas as pl
from jax.experimental.pallas import tpu as pltpu


# ------------------------------------------------------------------
# Fused kernel: one batch element per grid step.
# ------------------------------------------------------------------
def ladh_kernel(xp_ref, m1_ref, b1_ref, m2_ref, b23_ref,
                wfc_ref, fcb_ref, bcast_ref, shift_ref, o_ref):
    # xp_ref   : (1, H+2, W*Cin)   row-padded input, (w, cin) flattened on lanes
    # m1_ref   : (3, W*Cin, W*C)   banded conv1 weights (bn1 scale folded), one band per ky
    # b1_ref   : (1, W*C)          folded bn1 bias (incl. conv1 bias), tiled over W
    # m2_ref   : (3, W*C, 2*W*C)   banded conv2|conv3 weights (bn2/bn3 scales folded)
    # b23_ref  : (1, 2*W*C)        folded bn2|bn3 bias, tiled over W
    # wfc_ref  : (W*C, C)          avg-pool (sum over w) folded into the fc weight
    # fcb_ref  : (1, C)            fc bias
    # bcast_ref: (C, W*C)          0/1 matrix broadcasting the gate back to lanes
    # shift_ref: (2H, H)           stacked 0/1 row shift-down | shift-up matrices
    # o_ref    : (1, H, W*C)       lane-dense result
    H = o_ref.shape[1]
    WC = o_ref.shape[2]

    xp = xp_ref[0]                                                # (H+2, W*Cin)

    # ---- stage 1: conv1 (+ folded bn1 scale) + bias + relu  (3 wide MXU matmuls) ----
    acc = jnp.dot(xp[0:H, :], m1_ref[0], preferred_element_type=jnp.float32)
    acc = acc + jnp.dot(xp[1:H + 1, :], m1_ref[1], preferred_element_type=jnp.float32)
    acc = acc + jnp.dot(xp[2:H + 2, :], m1_ref[2], preferred_element_type=jnp.float32)
    out = jnp.maximum(acc + b1_ref[...], 0.0)                     # (H, W*C)

    # ---- channel gate: global avg pool + fc + sigmoid (pool folded into wfc) ----
    pooled = jnp.sum(out, axis=0, keepdims=True)                  # (1, W*C)
    z = jnp.dot(pooled, wfc_ref[...],
                preferred_element_type=jnp.float32) + fcb_ref[...]  # (1, C)
    g_wc = jnp.dot(jax.nn.sigmoid(z), bcast_ref[...],
                   preferred_element_type=jnp.float32)            # (1, W*C)

    # ---- stage 2: conv2 & conv3 with one concatenated banded weight ----
    # Row halo: one stacked shift matmul gives [shift-down ; shift-up] in one go;
    # the 8-aligned sublane slices below are free.  Column halo is inside m2.
    sh = jnp.dot(shift_ref[...], out, preferred_element_type=jnp.float32)  # (2H, W*C)
    acc2 = jnp.dot(sh[0:H, :], m2_ref[0], preferred_element_type=jnp.float32)
    acc2 = acc2 + jnp.dot(out, m2_ref[1], preferred_element_type=jnp.float32)
    acc2 = acc2 + jnp.dot(sh[H:2 * H, :], m2_ref[2], preferred_element_type=jnp.float32)
    y = acc2 + b23_ref[...]                                       # (H, 2*W*C)

    # out1 * sigmoid(gate) + out2   (lane-aligned slices at 0 and W*C)
    o_ref[0] = (y[:, :WC] * g_wc + y[:, WC:]).astype(o_ref.dtype)


# ------------------------------------------------------------------
# Pallas wrapper
# ------------------------------------------------------------------
def _ladh_pallas(xp2d, kp, H, W, C):
    B, Hp, WCin = xp2d.shape
    WC = W * C
    return pl.pallas_call(
        ladh_kernel,
        out_shape=jax.ShapeDtypeStruct((B, H, WC), jnp.float32),
        grid=(B,),
        in_specs=[
            pl.BlockSpec((1, Hp, WCin), lambda b: (b, 0, 0)),
            pl.BlockSpec((3, WCin, WC), lambda b: (0, 0, 0)),
            pl.BlockSpec((1, WC), lambda b: (0, 0)),
            pl.BlockSpec((3, WC, 2 * WC), lambda b: (0, 0, 0)),
            pl.BlockSpec((1, 2 * WC), lambda b: (0, 0)),
            pl.BlockSpec((WC, C), lambda b: (0, 0)),
            pl.BlockSpec((1, C), lambda b: (0, 0)),
            pl.BlockSpec((C, WC), lambda b: (0, 0)),
            pl.BlockSpec((2 * H, H), lambda b: (0, 0)),
        ],
        out_specs=pl.BlockSpec((1, H, WC), lambda b: (b, 0, 0)),
        compiler_params=pltpu.CompilerParams(dimension_semantics=("parallel",)),
    )(xp2d, kp["m1"], kp["b1t"], kp["m2"], kp["b23t"],
      kp["wfc"], kp["fcb"], kp["bcast"], kp["shift"])


def ladh_forward(x_nchw, kp):
    """Full LADH forward. Input/output are NCHW float32 (PyTorch convention)."""
    B, Cin, H, W = x_nchw.shape
    C = kp["C"]
    x = jnp.transpose(x_nchw, (0, 2, 3, 1))                       # NCHW -> NHWC
    xp = jnp.pad(x, ((0, 0), (1, 1), (0, 0), (0, 0)))             # row halo only
    xp2d = xp.reshape(B, H + 2, W * Cin)                          # lane-flatten (w, cin)
    y = _ladh_pallas(xp2d, kp, H, W, C)                           # (B, H, W*C)
    y = y.reshape(B, H, W, C)
    return jnp.transpose(y, (0, 3, 1, 2))                         # NHWC -> NCHW


# ------------------------------------------------------------------
# One-time (numpy) construction of the banded / folded kernel parameters
# ------------------------------------------------------------------
def prepare_kernel_params(p, H, W):
    w1 = np.asarray(p["w1"], np.float32)        # (3, 3, Cin, C)
    w2 = np.asarray(p["w2"], np.float32)        # (3, 3, C,  C)
    w3 = np.asarray(p["w3"], np.float32)        # (3, 3, C,  C)
    s1 = np.asarray(p["s1"], np.float32).reshape(-1)
    s2 = np.asarray(p["s2"], np.float32).reshape(-1)
    s3 = np.asarray(p["s3"], np.float32).reshape(-1)
    Cin, C = w1.shape[2], w1.shape[3]
    WC = W * C

    # Banded conv1 weight (bn1 scale folded into the output columns); the column
    # halo is handled by dropping out-of-range taps (same scheme as m2):
    #   m1[ky][ws*Cin + ci, w*C + co] = w1[ky, kx, ci, co] * s1[co],  ws = w + kx - 1
    m1 = np.zeros((3, W * Cin, WC), np.float32)
    for ky in range(3):
        for kx in range(3):
            for w in range(W):
                ws = w + kx - 1
                if 0 <= ws < W:
                    m1[ky, ws * Cin:(ws + 1) * Cin, w * C:(w + 1) * C] = w1[ky, kx] * s1[None, :]

    # Banded conv2|conv3 weight (bn2/bn3 scales folded, outputs concatenated):
    m2 = np.zeros((3, WC, 2 * WC), np.float32)
    for ky in range(3):
        for kx in range(3):
            for w in range(W):
                ws = w + kx - 1
                if 0 <= ws < W:
                    m2[ky, ws * C:(ws + 1) * C, w * C:(w + 1) * C] = w2[ky, kx] * s2[None, :]
                    m2[ky, ws * C:(ws + 1) * C, WC + w * C:WC + (w + 1) * C] = w3[ky, kx] * s3[None, :]

    # Stacked row shift-down | shift-up matrices (zero fill at the borders).
    shift = np.concatenate([np.eye(H, k=-1, dtype=np.float32),
                            np.eye(H, k=1, dtype=np.float32)], axis=0)   # (2H, H)

    # Channel-sum matrix (lane (w,c) -> channel c) and its transpose (broadcast back).
    smat = np.zeros((WC, C), np.float32)
    for w in range(W):
        smat[w * C:(w + 1) * C, :] = np.eye(C, dtype=np.float32)
    wfc = (smat @ np.asarray(p["fcwT"], np.float32)) / float(H * W)   # (W*C, C)
    bcast = smat.T                                                    # (C, W*C)

    def tile_row(v):                                   # (1, C) -> (1, W*C)
        return np.tile(np.asarray(v, np.float32).reshape(1, C), (1, W))

    return {
        "C": C,
        "m1": jnp.asarray(m1),
        "m2": jnp.asarray(m2),
        "shift": jnp.asarray(shift),
        "wfc": jnp.asarray(wfc),
        "fcb": jnp.asarray(np.asarray(p["fcb"], np.float32).reshape(1, C)),
        "bcast": jnp.asarray(bcast),
        "b1t": jnp.asarray(tile_row(p["b1"])),
        "b23t": jnp.asarray(np.concatenate([tile_row(p["b2"]), tile_row(p["b3"])], 1)),
    }


# ------------------------------------------------------------------
# Deterministic parameter construction (BN folded into scale / bias)
# ------------------------------------------------------------------
def make_params(key, cin, cout, eps=1e-5):
    ks = jax.random.split(key, 20)
    i = iter(range(20))

    def conv_params(cin_, cout_):
        w = jax.random.normal(ks[next(i)], (3, 3, cin_, cout_), jnp.float32) * 0.1
        b = jax.random.normal(ks[next(i)], (cout_,), jnp.float32) * 0.1
        return w, b

    def bn_params(c):
        gamma = 1.0 + 0.1 * jax.random.normal(ks[next(i)], (c,), jnp.float32)
        beta = 0.1 * jax.random.normal(ks[next(i)], (c,), jnp.float32)
        mean = 0.1 * jax.random.normal(ks[next(i)], (c,), jnp.float32)
        var = jax.random.uniform(ks[next(i)], (c,), jnp.float32, 0.5, 1.5)
        return gamma, beta, mean, var

    def fold(conv_b, gamma, beta, mean, var):
        scale = gamma / jnp.sqrt(var + eps)
        bias = beta - mean * scale + conv_b * scale
        return scale.reshape(1, -1), bias.reshape(1, -1)

    p = {}
    w1, cb1 = conv_params(cin, cout)
    p["w1"] = w1
    p["s1"], p["b1"] = fold(cb1, *bn_params(cout))
    w2, cb2 = conv_params(cout, cout)
    p["w2"] = w2
    p["s2"], p["b2"] = fold(cb2, *bn_params(cout))
    w3, cb3 = conv_params(cout, cout)
    p["w3"] = w3
    p["s3"], p["b3"] = fold(cb3, *bn_params(cout))

    fcw = jax.random.normal(ks[next(i)], (cout, cout), jnp.float32) * 0.1   # (out, in)
    fcb = jax.random.normal(ks[next(i)], (cout,), jnp.float32) * 0.1
    p["fcwT"] = fcw.T                        # so that y = m @ fcwT + fcb
    p["fcb"] = fcb.reshape(1, -1)
    return p


# ------------------------------------------------------------------
# Pure-JAX reference (for numerical verification)
# ------------------------------------------------------------------
def ladh_reference(x_nchw, p):
    x = jnp.transpose(x_nchw, (0, 2, 3, 1))

    def conv(z, w):
        return jax.lax.conv_general_dilated(
            z, w, (1, 1), "SAME",
            dimension_numbers=("NHWC", "HWIO", "NHWC"))

    out = jnp.maximum(conv(x, p["w1"]) * p["s1"] + p["b1"], 0.0)
    out1 = conv(out, p["w2"]) * p["s2"] + p["b2"]
    out2 = conv(out, p["w3"]) * p["s3"] + p["b3"]
    m = jnp.mean(out, axis=(1, 2))                           # (B, C)
    g = jax.nn.sigmoid(m @ p["fcwT"] + p["fcb"])             # (B, C)
    y = out1 * g[:, None, None, :] + out2
    return jnp.transpose(y, (0, 3, 1, 2))


if __name__ == "__main__":
    B, Cin, Cout, H, W = 2, 4, 8, 16, 16

    key = jax.random.PRNGKey(0)
    kx_, kp_ = jax.random.split(key)
    x = jax.random.normal(kx_, (B, Cin, H, W), jnp.float32)   # NCHW like PyTorch
    params = make_params(kp_, Cin, Cout)
    kparams = prepare_kernel_params(params, H, W)

    fwd = jax.jit(lambda xx: ladh_forward(xx, kparams))
    y = jax.block_until_ready(fwd(x))

    y_ref = jax.block_until_ready(ladh_reference(x, params))
    np.testing.assert_allclose(np.asarray(y), np.asarray(y_ref),
                               rtol=1e-4, atol=1e-4)
    assert y.shape == (B, Cout, H, W)

    print("KERNEL_OK")
</pallas_src>

<mosaic_0001>
module attributes {stable_mosaic.version = 11 : i64} {
  func.func @ladh_kernel(%arg0: i32, %arg1: memref<1x18x64xf32, #tpu.memory_space<vmem>>, %arg2: memref<3x64x128xf32, #tpu.memory_space<vmem>>, %arg3: memref<1x128xf32, #tpu.memory_space<vmem>>, %arg4: memref<3x128x256xf32, #tpu.memory_space<vmem>>, %arg5: memref<1x256xf32, #tpu.memory_space<vmem>>, %arg6: memref<128x8xf32, #tpu.memory_space<vmem>>, %arg7: memref<1x8xf32, #tpu.memory_space<vmem>>, %arg8: memref<8x128xf32, #tpu.memory_space<vmem>>, %arg9: memref<32x16xf32, #tpu.memory_space<vmem>>, %arg10: memref<1x16x128xf32, #tpu.memory_space<vmem>>) attributes {dimension_semantics = [#tpu.dimension_semantics<parallel>], iteration_bounds = array<i64: 2>, scalar_prefetch = 0 : i64, scratch_operands = 0 : i64, tpu.core_type = #tpu.core_type<tc>, window_params = [{transform_indices = @transform_0, window_bounds = array<i64: 1, 18, 64>}, {pipeline_mode = #tpu.pipeline_mode<synchronous>, transform_indices = @transform_1, window_bounds = array<i64: 3, 64, 128>}, {pipeline_mode = #tpu.pipeline_mode<synchronous>, transform_indices = @transform_2, window_bounds = array<i64: 1, 128>}, {pipeline_mode = #tpu.pipeline_mode<synchronous>, transform_indices = @transform_3, window_bounds = array<i64: 3, 128, 256>}, {pipeline_mode = #tpu.pipeline_mode<synchronous>, transform_indices = @transform_4, window_bounds = array<i64: 1, 256>}, {pipeline_mode = #tpu.pipeline_mode<synchronous>, transform_indices = @transform_5, window_bounds = array<i64: 128, 8>}, {pipeline_mode = #tpu.pipeline_mode<synchronous>, transform_indices = @transform_6, window_bounds = array<i64: 1, 8>}, {pipeline_mode = #tpu.pipeline_mode<synchronous>, transform_indices = @transform_7, window_bounds = array<i64: 8, 128>}, {pipeline_mode = #tpu.pipeline_mode<synchronous>, transform_indices = @transform_8, window_bounds = array<i64: 32, 16>}, {transform_indices = @transform_9, window_bounds = array<i64: 1, 16, 128>}]} {
    %c0 = arith.constant 0 : index
    %c0_0 = arith.constant 0 : index
    %c0_1 = arith.constant 0 : index
    %0 = vector.load %arg1[%c0, %c0_0, %c0_1] : memref<1x18x64xf32, #tpu.memory_space<vmem>>, vector<1x18x64xf32>
    %1 = vector.shape_cast %0 : vector<1x18x64xf32> to vector<18x64xf32>
    %2 = vector.extract_strided_slice %1 {offsets = [0, 0], sizes = [16, 64], strides = [1, 1]} : vector<18x64xf32> to vector<16x64xf32>
    %c0_2 = arith.constant 0 : index
    %c0_3 = arith.constant 0 : index
    %c0_4 = arith.constant 0 : index
    %3 = vector.load %arg2[%c0_2, %c0_3, %c0_4] : memref<3x64x128xf32, #tpu.memory_space<vmem>>, vector<1x64x128xf32>
    %4 = vector.shape_cast %3 : vector<1x64x128xf32> to vector<64x128xf32>
    %cst = arith.constant dense<0.000000e+00> : vector<16x128xf32>
    %5 = tpu.matmul %2, %4, %cst {dimension_numbers = #tpu.dot_dimension_numbers<[1], [0], [0], [1], [0, 0, 1, 1], [], []>} : vector<16x64xf32>, vector<64x128xf32>, vector<16x128xf32> -> vector<16x128xf32>
    %6 = vector.extract_strided_slice %1 {offsets = [1, 0], sizes = [16, 64], strides = [1, 1]} : vector<18x64xf32> to vector<16x64xf32>
    %c1 = arith.constant 1 : index
    %c0_5 = arith.constant 0 : index
    %c0_6 = arith.constant 0 : index
    %7 = vector.load %arg2[%c1, %c0_5, %c0_6] : memref<3x64x128xf32, #tpu.memory_space<vmem>>, vector<1x64x128xf32>
    %8 = vector.shape_cast %7 : vector<1x64x128xf32> to vector<64x128xf32>
    %cst_7 = arith.constant dense<0.000000e+00> : vector<16x128xf32>
    %9 = tpu.matmul %6, %8, %cst_7 {dimension_numbers = #tpu.dot_dimension_numbers<[1], [0], [0], [1], [0, 0, 1, 1], [], []>} : vector<16x64xf32>, vector<64x128xf32>, vector<16x128xf32> -> vector<16x128xf32>
    %10 = arith.addf %5, %9 : vector<16x128xf32>
    %11 = vector.extract_strided_slice %1 {offsets = [2, 0], sizes = [16, 64], strides = [1, 1]} : vector<18x64xf32> to vector<16x64xf32>
    %c2 = arith.constant 2 : index
    %c0_8 = arith.constant 0 : index
    %c0_9 = arith.constant 0 : index
    %12 = vector.load %arg2[%c2, %c0_8, %c0_9] : memref<3x64x128xf32, #tpu.memory_space<vmem>>, vector<1x64x128xf32>
    %13 = vector.shape_cast %12 : vector<1x64x128xf32> to vector<64x128xf32>
    %cst_10 = arith.constant dense<0.000000e+00> : vector<16x128xf32>
    %14 = tpu.matmul %11, %13, %cst_10 {dimension_numbers = #tpu.dot_dimension_numbers<[1], [0], [0], [1], [0, 0, 1, 1], [], []>} : vector<16x64xf32>, vector<64x128xf32>, vector<16x128xf32> -> vector<16x128xf32>
    %15 = arith.addf %10, %14 : vector<16x128xf32>
    %c0_11 = arith.constant 0 : index
    %c0_12 = arith.constant 0 : index
    %16 = vector.load %arg3[%c0_11, %c0_12] : memref<1x128xf32, #tpu.memory_space<vmem>>, vector<1x128xf32>
    %17 = vector.broadcast %16 : vector<1x128xf32> to vector<16x128xf32>
    %18 = arith.addf %15, %17 : vector<16x128xf32>
    %cst_13 = arith.constant 0.000000e+00 : f32
    %19 = vector.broadcast %cst_13 : f32 to vector<16x128xf32>
    %20 = arith.maximumf %18, %19 : vector<16x128xf32>
    %cst_14 = arith.constant dense<0.000000e+00> : vector<128xf32>
    %21 = vector.multi_reduction <add>, %20, %cst_14 [0] : vector<16x128xf32> to vector<128xf32>
    %22 = vector.shape_cast %21 : vector<128xf32> to vector<1x128xf32>
    %c0_15 = arith.constant 0 : index
    %c0_16 = arith.constant 0 : index
    %23 = vector.load %arg6[%c0_15, %c0_16] : memref<128x8xf32, #tpu.memory_space<vmem>>, vector<128x8xf32>
    %cst_17 = arith.constant dense<0.000000e+00> : vector<1x8xf32>
    %24 = tpu.matmul %22, %23, %cst_17 {dimension_numbers = #tpu.dot_dimension_numbers<[1], [0], [0], [1], [0, 0, 1, 1], [], []>} : vector<1x128xf32>, vector<128x8xf32>, vector<1x8xf32> -> vector<1x8xf32>
    %c0_18 = arith.constant 0 : index
    %c0_19 = arith.constant 0 : index
    %25 = vector.load %arg7[%c0_18, %c0_19] : memref<1x8xf32, #tpu.memory_space<vmem>>, vector<1x8xf32>
    %26 = arith.addf %24, %25 : vector<1x8xf32>
    %27 = arith.negf %26 : vector<1x8xf32>
    %28 = math.exp %27 : vector<1x8xf32>
    %cst_20 = arith.constant 1.000000e+00 : f32
    %29 = vector.broadcast %cst_20 : f32 to vector<1x8xf32>
    %30 = arith.addf %29, %28 : vector<1x8xf32>
    %31 = arith.divf %29, %30 : vector<1x8xf32>
    %c0_21 = arith.constant 0 : index
    %c0_22 = arith.constant 0 : index
    %32 = vector.load %arg8[%c0_21, %c0_22] : memref<8x128xf32, #tpu.memory_space<vmem>>, vector<8x128xf32>
    %cst_23 = arith.constant dense<0.000000e+00> : vector<1x128xf32>
    %33 = tpu.matmul %31, %32, %cst_23 {dimension_numbers = #tpu.dot_dimension_numbers<[1], [0], [0], [1], [0, 0, 1, 1], [], []>} : vector<1x8xf32>, vector<8x128xf32>, vector<1x128xf32> -> vector<1x128xf32>
    %c0_24 = arith.constant 0 : index
    %c0_25 = arith.constant 0 : index
    %34 = vector.load %arg9[%c0_24, %c0_25] : memref<32x16xf32, #tpu.memory_space<vmem>>, vector<32x16xf32>
    %cst_26 = arith.constant dense<0.000000e+00> : vector<32x128xf32>
    %35 = tpu.matmul %34, %20, %cst_26 {dimension_numbers = #tpu.dot_dimension_numbers<[1], [0], [0], [1], [0, 0, 1, 1], [], []>} : vector<32x16xf32>, vector<16x128xf32>, vector<32x128xf32> -> vector<32x128xf32>
    %36 = vector.extract_strided_slice %35 {offsets = [0, 0], sizes = [16, 128], strides = [1, 1]} : vector<32x128xf32> to vector<16x128xf32>
    %c0_27 = arith.constant 0 : index
    %c0_28 = arith.constant 0 : index
    %c0_29 = arith.constant 0 : index
    %37 = vector.load %arg4[%c0_27, %c0_28, %c0_29] : memref<3x128x256xf32, #tpu.memory_space<vmem>>, vector<1x128x256xf32>
    %38 = vector.shape_cast %37 : vector<1x128x256xf32> to vector<128x256xf32>
    %cst_30 = arith.constant dense<0.000000e+00> : vector<16x256xf32>
    %39 = tpu.matmul %36, %38, %cst_30 {dimension_numbers = #tpu.dot_dimension_numbers<[1], [0], [0], [1], [0, 0, 1, 1], [], []>} : vector<16x128xf32>, vector<128x256xf32>, vector<16x256xf32> -> vector<16x256xf32>
    %c1_31 = arith.constant 1 : index
    %c0_32 = arith.constant 0 : index
    %c0_33 = arith.constant 0 : index
    %40 = vector.load %arg4[%c1_31, %c0_32, %c0_33] : memref<3x128x256xf32, #tpu.memory_space<vmem>>, vector<1x128x256xf32>
    %41 = vector.shape_cast %40 : vector<1x128x256xf32> to vector<128x256xf32>
    %cst_34 = arith.constant dense<0.000000e+00> : vector<16x256xf32>
    %42 = tpu.matmul %20, %41, %cst_34 {dimension_numbers = #tpu.dot_dimension_numbers<[1], [0], [0], [1], [0, 0, 1, 1], [], []>} : vector<16x128xf32>, vector<128x256xf32>, vector<16x256xf32> -> vector<16x256xf32>
    %43 = arith.addf %39, %42 : vector<16x256xf32>
    %44 = vector.extract_strided_slice %35 {offsets = [16, 0], sizes = [16, 128], strides = [1, 1]} : vector<32x128xf32> to vector<16x128xf32>
    %c2_35 = arith.constant 2 : index
    %c0_36 = arith.constant 0 : index
    %c0_37 = arith.constant 0 : index
    %45 = vector.load %arg4[%c2_35, %c0_36, %c0_37] : memref<3x128x256xf32, #tpu.memory_space<vmem>>, vector<1x128x256xf32>
    %46 = vector.shape_cast %45 : vector<1x128x256xf32> to vector<128x256xf32>
    %cst_38 = arith.constant dense<0.000000e+00> : vector<16x256xf32>
    %47 = tpu.matmul %44, %46, %cst_38 {dimension_numbers = #tpu.dot_dimension_numbers<[1], [0], [0], [1], [0, 0, 1, 1], [], []>} : vector<16x128xf32>, vector<128x256xf32>, vector<16x256xf32> -> vector<16x256xf32>
    %48 = arith.addf %43, %47 : vector<16x256xf32>
    %c0_39 = arith.constant 0 : index
    %c0_40 = arith.constant 0 : index
    %49 = vector.load %arg5[%c0_39, %c0_40] : memref<1x256xf32, #tpu.memory_space<vmem>>, vector<1x256xf32>
    %50 = vector.broadcast %49 : vector<1x256xf32> to vector<16x256xf32>
    %51 = arith.addf %48, %50 : vector<16x256xf32>
    %52 = vector.extract_strided_slice %51 {offsets = [0, 0], sizes = [16, 128], strides = [1, 1]} : vector<16x256xf32> to vector<16x128xf32>
    %53 = vector.broadcast %33 : vector<1x128xf32> to vector<16x128xf32>
    %54 = arith.mulf %52, %53 : vector<16x128xf32>
    %55 = vector.extract_strided_slice %51 {offsets = [0, 128], sizes = [16, 128], strides = [1, 1]} : vector<16x256xf32> to vector<16x128xf32>
    %56 = arith.addf %54, %55 : vector<16x128xf32>
    %c0_41 = arith.constant 0 : index
    %c0_42 = arith.constant 0 : index
    %c0_43 = arith.constant 0 : index
    %57 = vector.load %arg10[%c0_41, %c0_42, %c0_43] : memref<1x16x128xf32, #tpu.memory_space<vmem>>, vector<1x16x128xf32>
    %58 = vector.shape_cast %57 : vector<1x16x128xf32> to vector<16x128xf32>
    %59 = vector.shape_cast %56 : vector<16x128xf32> to vector<1x16x128xf32>
    tpu.vector_store %arg10[%c0_41, %c0_42, %c0_43], %59 {strides = array<i32>} : memref<1x16x128xf32, #tpu.memory_space<vmem>>, vector<1x16x128xf32>,
    return
  }
  func.func @transform_0(%arg0: i32) -> (i32, i32, i32) {
    %c0_i32 = arith.constant 0 : i32
    %c0_i32_0 = arith.constant 0 : i32
    %c0_i32_1 = arith.constant 0 : i32
    return %arg0, %c0_i32, %c0_i32_0 : i32, i32, i32
  }
  func.func @transform_1(%arg0: i32) -> (i32, i32, i32) {
    %c0_i32 = arith.constant 0 : i32
    %c0_i32_0 = arith.constant 0 : i32
    %c0_i32_1 = arith.constant 0 : i32
    %c0_i32_2 = arith.constant 0 : i32
    return %c0_i32, %c0_i32_0, %c0_i32_1 : i32, i32, i32
  }
  func.func @transform_2(%arg0: i32) -> (i32, i32) {
    %c0_i32 = arith.constant 0 : i32
    %c0_i32_0 = arith.constant 0 : i32
    %c0_i32_1 = arith.constant 0 : i32
    return %c0_i32, %c0_i32_0 : i32, i32
  }
  func.func @transform_3(%arg0: i32) -> (i32, i32, i32) {
    %c0_i32 = arith.constant 0 : i32
    %c0_i32_0 = arith.constant 0 : i32
    %c0_i32_1 = arith.constant 0 : i32
    %c0_i32_2 = arith.constant 0 : i32
    return %c0_i32, %c0_i32_0, %c0_i32_1 : i32, i32, i32
  }
  func.func @transform_4(%arg0: i32) -> (i32, i32) {
    %c0_i32 = arith.constant 0 : i32
    %c0_i32_0 = arith.constant 0 : i32
    %c0_i32_1 = arith.constant 0 : i32
    return %c0_i32, %c0_i32_0 : i32, i32
  }
  func.func @transform_5(%arg0: i32) -> (i32, i32) {
    %c0_i32 = arith.constant 0 : i32
    %c0_i32_0 = arith.constant 0 : i32
    %c0_i32_1 = arith.constant 0 : i32
    return %c0_i32, %c0_i32_0 : i32, i32
  }
  func.func @transform_6(%arg0: i32) -> (i32, i32) {
    %c0_i32 = arith.constant 0 : i32
    %c0_i32_0 = arith.constant 0 : i32
    %c0_i32_1 = arith.constant 0 : i32
    return %c0_i32, %c0_i32_0 : i32, i32
  }
  func.func @transform_7(%arg0: i32) -> (i32, i32) {
    %c0_i32 = arith.constant 0 : i32
    %c0_i32_0 = arith.constant 0 : i32
    %c0_i32_1 = arith.constant 0 : i32
    return %c0_i32, %c0_i32_0 : i32, i32
  }
  func.func @transform_8(%arg0: i32) -> (i32, i32) {
    %c0_i32 = arith.constant 0 : i32
    %c0_i32_0 = arith.constant 0 : i32
    %c0_i32_1 = arith.constant 0 : i32
    return %c0_i32, %c0_i32_0 : i32, i32
  }
  func.func @transform_9(%arg0: i32) -> (i32, i32, i32) {
    %c0_i32 = arith.constant 0 : i32
    %c0_i32_0 = arith.constant 0 : i32
    %c0_i32_1 = arith.constant 0 : i32
    return %arg0, %c0_i32, %c0_i32_0 : i32, i32, i32
  }
}

</mosaic_0001>

<bundles_post_ra>
// kernel: _lambda_.1
= control target key start
LH: loop header
LB: loop body
LE: loop exit
PB: predicated region body
PF: predicated region fallthrough
CT: control target
= control target key end

     0   :  { %14 = vsyncpa [#allocation3], 0  ;;  %s1671_s30 = smov 0   ;;  %s1909_s0 = inlined_call_operand.vmem [shape: f32[2,18,64], index: 0, kind: input, shape index: {}]   ;;  %s1910_s1 = inlined_call_operand.vmem [shape: f32[3,64,128], index: 1, kind: input, shape index: {}]   ;;  %s1911_s2 = inlined_call_operand.vmem [shape: f32[1,128], index: 2, kind: input, shape index: {}]   ;;  %s1912_s3 = inlined_call_operand.hbm [shape: f32[3,128,256], index: 3, kind: input, shape index: {}]   ;;  %s1913_s4 = inlined_call_operand.vmem [shape: f32[1,256], index: 4, kind: input, shape index: {}]   ;;  %s1914_s5 = inlined_call_operand.vmem [shape: f32[128,8], index: 5, kind: input, shape index: {}]   ;;  %s1915_s6 = inlined_call_operand.vmem [shape: f32[1,8], index: 6, kind: input, shape index: {}]   ;;  %s1916_s7 = inlined_call_operand.vmem [shape: f32[8,128], index: 7, kind: input, shape index: {}]   ;;  %s1917_s8 = inlined_call_operand.vmem [shape: f32[32,16], index: 8, kind: input, shape index: {}]   ;;  %s1918_s9 = inlined_call_operand.vmem [shape: f32[2,16,128], index: 9, kind: output, shape index: {}]  }
   0x1 LB: > { %s1346_s10 = sadd.s32 4294967295, %s1614_s30   ;;  %p1348_p0 = scmp.ge.s32.totalorder %s1614_s30, 1  ;;  %s1614_s30 = sphi %s1671_s30, %s20_s30  }
   0x2   : > { %p245_p1 = scmp.lt.s32.totalorder %s1614_s30, 3  ;;  %s1616_s11 = smov [#allocation2]  }
   0x3   : > { %s263_s12 = sshll.u32 %s1616_s11, 4  ;;  %p1559_p3 = scmp.eq.s32.totalorder %s1346_s10, 0  ;;  %s264_s12 = int_to_ptr.vmem [resolvable:$true] %s263_s12 }
   0x4   : > { %p1679_p2 = pnand %p1348_p0, %p245_p1  ;;  %s1589_s14 = scalar_lea.vmem %s264_s12, 12288 }
   0x5   : > { %p1590_p7 = scmp.ne.s32.totalorder %s264_s12, %s1589_s14  ;;  %p1597_p10 = scmp.lt.s32.totalorder %s264_s12, %s264_s12 }
   0x6   : > { %p1555_p4 = pneg %p1679_p2  ;;  %p1598_p11 = scmp.lt.s32.totalorder %s1589_s14, %s1589_s14 }
   0x8   : > { %p1556_p5 = pnand %p1559_p3, %p1555_p4  ;;  %p1599_p12 = por %p1598_p11, %p1597_p10 }
   0xa   : > { %p1580_p6 = pneg %p1556_p5 }
   0xc   : > { %p1592_p8 = pnand %p1590_p7, %p1580_p6 }
   0xe   : > { %p1593_p9 = pneg %p1592_p8 }
  0x10   : > { %p1600_p13 = pnand %p1599_p12, %p1593_p9 }
  0x12   : > { %1603 = shalt.err (!%p1600_p13)
}
  0x13   : > { %s1617_s15 = smov 256   ;;  %s1618_s16 = smov 16  }
  0x14   : > { %1558 = dma.hbm_to_vmem [thread:$0]  (!%p1556_p5), %s1912_s3, 12288, %s264_s12, [#allocation3], %s1617_s15, %s1617_s15, %s1618_s16  }
  0x15   : > { %302 = sbr.rel (%p1679_p2) target bundleno = 913 (0x391), region = 56 }
  0x1a   : > { %1609 = dma.done.wait (%p1559_p3), [#allocation3], 12288  }
  0x1b   : > { %1611 = vsyncadd (%p1559_p3), [#allocation3], 4294955008  ;;  %p338_p0 = scmp.lt.s32.totalorder %s1346_s10, 1  ;;  %v1363_v0 = vld [vmem:[%s1910_s1 + $0x78] sm:$0xff]  ;;  %v1362_v1 = vld [vmem:[%s1910_s1 + $0x70] sm:$0xff]  ;;  %vm371_vm0 = vcmask 1046528  }
  0x1c   : > { %1443 = vmatprep.subr.mxu1 %v1363_v0  ;;  %v1361_v2 = vld [vmem:[%s1910_s1 + $0x68] sm:$0xff]  ;;  %v1360_v6 = vld [vmem:[%s1910_s1 + $0x60] sm:$0xff]  ;;  %vm377_vm1 = vcmask 523264   ;;  %v1375_v8 = vld [vmem:[%s1910_s1 + $0xb8] sm:$0xff]  ;;  %vm545_vm2 = vcmask 1045504   ;;  %v1619_v38 = vmov 0.0  }
  0x1d   : > { %s1921_s10 = smov (!%p338_p0, %s1346_s10), 1  ;;  %1444 = vmatpush3.msra.mxu1 %v1363_v0  ;;  %1481 = vmatprep.subr.mxu0 %v1375_v8  ;;  %v1374_v9 = vld [vmem:[%s1910_s1 + $0xb0] sm:$0xff]  ;;  %v1359_v10 = vld [vmem:[%s1910_s1 + $0x58] sm:$0xff]  ;;  %v1373_v13 = vld [vmem:[%s1910_s1 + $0xa8] sm:$0xff]  ;;  %vm1620_vm3 = vmmov 0   ;;  %vm744_vm4 = vcmask 64512  }
  0x1e   : > { %s1550_s19 = smul.u32 24, %s1921_s10  ;;  %1445 = vmatprep.subr.mxu1 %v1362_v1  ;;  %1482 = vmatpush3.msra.mxu0 %v1375_v8  ;;  %v1358_v14 = vld [vmem:[%s1910_s1 + $0x50] sm:$0xff]  ;;  %v1372_v15 = vld [vmem:[%s1910_s1 + $0xa0] sm:$0xff]  ;;  %v1357_v16 = vld [vmem:[%s1910_s1 + $0x48] sm:$0xff]  ;;  %vm822_vm5 = vcmask 130048   ;;  %s1387_s25 = sshll.u32 %s1921_s10, 4 }
  0x1f   : > { %1446 = vmatpush3.msra.mxu1 %v1362_v1  ;;  %1483 = vmatprep.subr.mxu0 %v1374_v9  ;;  %v1371_v18 = vld [vmem:[%s1910_s1 + $0x98] sm:$0xff]  ;;  %v1356_v19 = vld [vmem:[%s1910_s1 + $0x40] sm:$0xff]  ;;  %v1370_v20 = vld [vmem:[%s1910_s1 + $0x90] sm:$0xff]  ;;  %s347_s27 = scalar_lea.vmem %s1918_s9, %s1387_s25 }
  0x20   : > { %s342_s22 = scalar_lea.vmem %s1909_s0, %s1550_s19  ;;  %1447 = vmatprep.subr.mxu1 %v1361_v2  ;;  %1484 = vmatpush3.msra.mxu0 %v1374_v9  ;;  %v358_v22 = vld [vmem:[%s1910_s1 + $0x38] sm:$0xff]  ;;  %v357_v23 = vld [vmem:[%s1910_s1 + $0x30] sm:$0xff]  ;;  %v1369_v24 = vld [vmem:[%s1910_s1 + $0x88] sm:$0xff] }
  0x21   : > { %v1708_v3 = vld [vmem:[%s342_s22] sm:$0xff]  ;;  %v1710_v4 = vld [vmem:[%s342_s22 + $0x8] sm:$0xff]  ;;  %1448 = vmatpush3.msra.mxu1 %v1361_v2  ;;  %v350_v12 = vld [vmem:[%s342_s22 + $0x10] sm:$0x3]  ;;  %1485 = vmatprep.subr.mxu0 %v1373_v13 }
  0x22   : > { %v372_v5 = vrot.slane %v1708_v3, 1  ;;  %v373_v7 = vrot.slane %v1710_v4, 1  ;;  %1449 = vmatprep.subr.mxu1 %v1360_v6  ;;  %v375_v17 = vrot.slane %v350_v12, 1  ;;  %1486 = vmatpush3.msra.mxu0 %v1373_v13  ;;  %v546_v25 = vrot.slane %v1708_v3, 2  ;;  %v356_v27 = vld [vmem:[%s1910_s1 + $0x28] sm:$0xff]  ;;  %v1368_v28 = vld [vmem:[%s1910_s1 + $0x80] sm:$0xff] }
  0x23   : > { %1450 = vmatpush3.msra.mxu1 %v1360_v6  ;;  %1487 = vmatprep.subr.mxu0 %v1372_v15  ;;  %v547_v26 = vrot.slane %v1710_v4, 2  ;;  %v549_v29 = vrot.slane %v350_v12, 2  ;;  %v355_v30 = vld [vmem:[%s1910_s1 + $0x20] sm:$0xff]  ;;  %v354_v32 = vld [vmem:[%s1910_s1 + $0x18] sm:$0xff]  ;;  %v353_v34 = vld [vmem:[%s1910_s1 + $0x10] sm:$0xff] }
  0x24   : > { %v374_v11 = vsel %vm371_vm0, %v372_v5, %v373_v7  ;;  %1451 = vmatprep.subr.mxu1 %v1359_v10  ;;  %1488 = vmatpush3.msra.mxu0 %v1372_v15  ;;  %v376_v21 = vsel %vm371_vm0, %v373_v7, %v375_v17  ;;  %v352_v35 = vld [vmem:[%s1910_s1 + $0x8] sm:$0xff]  ;;  %v351_v36 = vld [vmem:[%s1910_s1] sm:$0xff]  ;;  %v665_v37 = vld [vmem:[%s1914_s5 + $0x78] sm:$0xff] }
  0x25   : > { %1459 = vmatprep.mubr.msk.f32.mxu1 %vm377_vm1, %v374_v11  ;;  %1452 = vmatpush3.msra.mxu1 %v1359_v10  ;;  %v548_v31 = vsel %vm545_vm2, %v546_v25, %v547_v26  ;;  %v550_v33 = vsel %vm545_vm2, %v547_v26, %v549_v29  ;;  %v664_v39 = vld [vmem:[%s1914_s5 + $0x70] sm:$0xff]  ;;  %v663_v40 = vld [vmem:[%s1914_s5 + $0x68] sm:$0xff]  ;;  %v662_v41 = vld [vmem:[%s1914_s5 + $0x60] sm:$0xff] }
  0x26   : > { %1453 = vmatprep.subr.mxu1 %v1358_v14  ;;  %1489 = vmatprep.subr.mxu0 %v1371_v18  ;;  %v661_v42 = vld [vmem:[%s1914_s5 + $0x58] sm:$0xff]  ;;  %v660_v43 = vld [vmem:[%s1914_s5 + $0x50] sm:$0xff]  ;;  %v659_v44 = vld [vmem:[%s1914_s5 + $0x48] sm:$0xff] }
  0x27   : > { %1454 = vmatpush3.msra.mxu1 %v1358_v14  ;;  %1490 = vmatpush3.msra.mxu0 %v1371_v18  ;;  %v658_v45 = vld [vmem:[%s1914_s5 + $0x40] sm:$0xff]  ;;  %v657_v47 = vld [vmem:[%s1914_s5 + $0x38] sm:$0xff]  ;;  %v656_v48 = vld [vmem:[%s1914_s5 + $0x30] sm:$0xff] }
  0x28   : > { %1455 = vmatprep.subr.mxu1 %v1357_v16  ;;  %1491 = vmatprep.subr.mxu0 %v1370_v20  ;;  %v743_v46 = vld [vmem:[%s1916_s7] sm:$0xff]  ;;  %v655_v49 = vld [vmem:[%s1914_s5 + $0x28] sm:$0xff]  ;;  %v653_v51 = vld [vmem:[%s1914_s5 + $0x18] sm:$0xff] }
  0x29   : > { %1456 = vmatpush3.msra.mxu1 %v1357_v16  ;;  %1492 = vmatpush3.msra.mxu0 %v1370_v20  ;;  %v654_v50 = vld [vmem:[%s1914_s5 + $0x20] sm:$0xff]  ;;  %v652_v52 = vld [vmem:[%s1914_s5 + $0x10] sm:$0xff]  ;;  %v651_v53 = vld [vmem:[%s1914_s5 + $0x8] sm:$0xff] }
  0x2a   : > { %1457 = vmatprep.subr.mxu1 %v1356_v19  ;;  %1493 = vmatprep.subr.mxu0 %v1369_v24  ;;  %v650_v54 = vld [vmem:[%s1914_s5] sm:$0xff]  ;;  %v951_v13 = vld [vmem:[#allocation2 + $0xf8] sm:$0xff]  ;;  %v950_v14 = vld [vmem:[#allocation2 + $0xf0] sm:$0xff] }
  0x2b   : > { %1458 = vmatpush3.msra.mxu1 %v1356_v19  ;;  %1494 = vmatpush3.msra.mxu0 %v1369_v24  ;;  %v1378_v60 = vld [vmem:[%s1911_s2] ss:$0 sm:$0xff]  ;;  %v949_v15 = vld [vmem:[#allocation2 + $0xe8] sm:$0xff]  ;;  %v947_v17 = vld [vmem:[#allocation2 + $0xd8] sm:$0xff] }
  0x2c   : > { %1460 = vmatmul.mubr.msk.f32.vlgmr.msra.gmra.mxu1 %vm377_vm1, %v376_v21  ;;  %1462 = vmatprep.subr.mxu1 %v358_v22  ;;  %v948_v16 = vld [vmem:[#allocation2 + $0xe0] sm:$0xff]  ;;  %v946_v18 = vld [vmem:[#allocation2 + $0xd0] sm:$0xff]  ;;  %v945_v19 = vld [vmem:[#allocation2 + $0xc8] sm:$0xff] }
  0x2d   : > { %1463 = vmatpush3.msra.mxu1 %v358_v22  ;;  %1495 = vmatprep.subr.mxu0 %v1368_v28  ;;  %v944_v20 = vld [vmem:[#allocation2 + $0xc0] sm:$0xff]  ;;  %v943_v21 = vld [vmem:[#allocation2 + $0xb8] sm:$0xff]  ;;  %v942_v22 = vld [vmem:[#allocation2 + $0xb0] sm:$0xff] }
  0x2e   : > { %1464 = vmatprep.subr.mxu1 %v357_v23  ;;  %1478 = vmatprep.mubr.msk.f32.mxu1 %vm377_vm1, %v1708_v3  ;;  %v940_v24 = vld [vmem:[#allocation2 + $0xa0] sm:$0xff]  ;;  %v939_v25 = vld [vmem:[#allocation2 + $0x98] sm:$0xff]  ;;  %v938_v26 = vld [vmem:[#allocation2 + $0x90] sm:$0xff] }
  0x2f   : > { %1465 = vmatpush3.msra.mxu1 %v357_v23  ;;  %1496 = vmatpush3.msra.mxu0 %v1368_v28  ;;  %v941_v23 = vld [vmem:[#allocation2 + $0xa8] sm:$0xff]  ;;  %v936_v28 = vld [vmem:[#allocation2 + $0x80] sm:$0xff]  ;;  %v935_v29 = vld [vmem:[#allocation2 + $0x78] sm:$0xff] }
  0x30   : > { %1466 = vmatprep.subr.mxu1 %v356_v27  ;;  %1497 = vmatprep.mubr.msk.f32.mxu0 %vm377_vm1, %v548_v31  ;;  %v933_v31 = vld [vmem:[#allocation2 + $0x68] sm:$0xff] }
  0x31   : > { %1467 = vmatpush3.msra.mxu1 %v356_v27  ;;  %1498 = vmatmul.mubr.msk.f32.vlgmr.msra.gmra.mxu0 %vm377_vm1, %v550_v33  ;;  %v937_v27 = vld [vmem:[#allocation2 + $0x88] sm:$0xff]  ;;  %v931_v33 = vld [vmem:[#allocation2 + $0x58] sm:$0xff] }
  0x32   : > { %1468 = vmatprep.subr.mxu1 %v355_v30  ;;  %1535 = vmatprep.subr.mxu0 %v1619_v38 }
  0x33   : > { %1469 = vmatpush3.msra.mxu1 %v355_v30  ;;  %1536 = vmatpush3.msra.mxu0 %v743_v46  ;;  %v934_v30 = vld [vmem:[#allocation2 + $0x70] sm:$0xff]  ;;  %v818_v46 = vld [vmem:[%s1917_s8] sm:$0xff] }
  0x34   : > { %1470 = vmatprep.subr.mxu1 %v354_v32  ;;  %1537 = vmatprep.mubr.msk.f32.mxu0 %vm1620_vm3, %v1619_v38 }
  0x35   : > { %1471 = vmatpush3.msra.mxu1 %v354_v32  ;;  %v932_v32 = vld [vmem:[#allocation2 + $0x60] sm:$0xff] }
  0x36   : > { %1472 = vmatprep.subr.mxu1 %v353_v34 }
  0x37   : > { %1473 = vmatpush3.msra.mxu1 %v353_v34  ;;  %v930_v34 = vld [vmem:[#allocation2 + $0x50] sm:$0xff] }
  0x38   : > { %1474 = vmatprep.subr.mxu1 %v352_v35 }
  0x39   : > { %1475 = vmatpush3.msra.mxu1 %v352_v35  ;;  %v929_v35 = vld [vmem:[#allocation2 + $0x48] sm:$0xff] }
  0x3a   : > { %1476 = vmatprep.subr.mxu1 %v351_v36 }
  0x3b   : > { %1477 = vmatpush3.msra.mxu1 %v351_v36  ;;  %v928_v36 = vld [vmem:[#allocation2 + $0x40] sm:$0xff] }
  0x3c   : > { %1479 = vmatmul.mubr.msk.f32.vlgmr.msra.gmra.mxu1 %vm377_vm1, %v1710_v4  ;;  %1500 = vmatprep.subr.mxu1 %v1619_v38 }
  0x3d   : > { %1501 = vmatpush3.msra.mxu1 %v665_v37  ;;  %1532 = vmatprep.mubr.msk.f32.mxu1 %vm1620_vm3, %v1619_v38  ;;  %v927_v37 = vld [vmem:[#allocation2 + $0x38] sm:$0xff] }
  0x3e   : > { %1502 = vmatprep.subr.mxu1 %v1619_v38 }
  0x3f   : > { %1503 = vmatpush3.msra.mxu1 %v664_v39  ;;  %v666_v39 = vld [vmem:[%s1915_s6] sm:$0x1] }
  0x40   : > { %1504 = vmatprep.subr.mxu1 %v1619_v38 }
  0x41   : > { %1505 = vmatpush3.msra.mxu1 %v663_v40 }
  0x42   : > { %1506 = vmatprep.subr.mxu1 %v1619_v38 }
  0x43   : > { %1507 = vmatpush3.msra.mxu1 %v662_v41 }
  0x44   : > { %1508 = vmatprep.subr.mxu1 %v1619_v38 }
  0x45   : > { %1509 = vmatpush3.msra.mxu1 %v661_v42 }
  0x46   : > { %1510 = vmatprep.subr.mxu1 %v1619_v38 }
  0x47   : > { %1511 = vmatpush3.msra.mxu1 %v660_v43 }
  0x48   : > { %1512 = vmatprep.subr.mxu1 %v1619_v38 }
  0x49   : > { %1513 = vmatpush3.msra.mxu1 %v659_v44 }
  0x4a   : > { %1514 = vmatprep.subr.mxu1 %v1619_v38 }
  0x4b   : > { %1515 = vmatpush3.msra.mxu1 %v658_v45 }
  0x4c   : > { %1516 = vmatprep.subr.mxu1 %v1619_v38 }
  0x4d   : > { %1517 = vmatpush3.msra.mxu1 %v657_v47 }
  0x4e   : > { %1518 = vmatprep.subr.mxu1 %v1619_v38 }
  0x4f   : > { %1519 = vmatpush3.msra.mxu1 %v656_v48  ;;  %v984_v48 = vld [vmem:[#allocation2 + $0x1f8] sm:$0xff] }
  0x50   : > { %1520 = vmatprep.subr.mxu1 %v1619_v38 }
  0x51   : > { %1521 = vmatpush3.msra.mxu1 %v655_v49  ;;  %v819_v49 = vld [vmem:[%s1917_s8 + $0x8] sm:$0xff] }
  0x52   : > { %1522 = vmatprep.subr.mxu1 %v1619_v38 }
  0x53   : > { %1523 = vmatpush3.msra.mxu1 %v654_v50  ;;  %v983_v50 = vld [vmem:[#allocation2 + $0x1f0] sm:$0xff] }
  0x54   : > { %1524 = vmatprep.subr.mxu1 %v1619_v38 }
  0x55   : > { %1525 = vmatpush3.msra.mxu1 %v653_v51  ;;  %v820_v51 = vld [vmem:[%s1917_s8 + $0x10] sm:$0xff] }
  0x56   : > { %1526 = vmatprep.subr.mxu1 %v1619_v38 }
  0x57   : > { %1527 = vmatpush3.msra.mxu1 %v652_v52  ;;  %v982_v52 = vld [vmem:[#allocation2 + $0x1e8] sm:$0xff] }
  0x58   : > { %1528 = vmatprep.subr.mxu1 %v1619_v38 }
  0x59   : > { %1529 = vmatpush3.msra.mxu1 %v651_v53  ;;  %v981_v53 = vld [vmem:[#allocation2 + $0x1e0] sm:$0xff] }
  0x5a   : > { %1530 = vmatprep.subr.mxu1 %v1619_v38 }
  0x5b   : > { %1531 = vmatpush3.msra.mxu1 %v650_v54  ;;  %v980_v54 = vld [vmem:[#allocation2 + $0x1d8] sm:$0xff] }
  0x5c   : > { %1062 = vmatprep.subr.mxu1 %v951_v13  ;;  %v960_v13 = vld [vmem:[#allocation2 + $0x138] sm:$0xff] }
  0xec   : > { %v1461_v55 = vpop.f32.mrf.mxu1 }
  0xee   : > { %v448_v56 = vpop.f32.mrf.mxu1 }
  0xf1   : > { %v1499_v58 = vpop.f32.mrf.mxu0 }
  0xf3   : > { %v621_v0 = vpop.f32.mrf.mxu0 }
  0xfc   : > { %v1480_v57 = vpop.f32.mrf.mxu1 }
  0xfd   : > { %v533_v59 = vadd.f32 %v1480_v57, %v1461_v55  ;;  %v821_v55 = vld [vmem:[%s1917_s8 + $0x18] sm:$0xff]  ;;  %v978_v57 = vld [vmem:[#allocation2 + $0x1c8] sm:$0xff] }
  0xfe   : > { %v527_v61 = vpop.f32.mrf.mxu1 }
  0xff   : > { %v631_v62 = vadd.f32 %v1499_v58, %v533_v59  ;;  %v528_v63 = vadd.f32 %v527_v61, %v448_v56  ;;  %v979_v56 = vld [vmem:[#allocation2 + $0x1d0] sm:$0xff]  ;;  %v977_v58 = vld [vmem:[#allocation2 + $0x1c0] sm:$0xff]  ;;  %v976_v59 = vld [vmem:[#allocation2 + $0x1b8] sm:$0xff] }
 0x100   : > { %v974_v61 = vld [vmem:[#allocation2 + $0x1a8] sm:$0xff] }
 0x101   : > { %v640_v1 = vadd.f32 %v1378_v60, %v631_v62  ;;  %v630_v2 = vadd.f32 %v621_v0, %v528_v63  ;;  %v973_v62 = vld [vmem:[#allocation2 + $0x1a0] sm:$0xff]  ;;  %v972_v63 = vld [vmem:[#allocation2 + $0x198] sm:$0xff]  ;;  %v971_v0 = vld [vmem:[#allocation2 + $0x190] sm:$0xff] }
 0x103   : > { %v1862_v3 = vmax.f32 %v640_v1, 0.0  ;;  %v639_v4 = vadd.f32 %v1378_v60, %v630_v2  ;;  %v975_v60 = vld [vmem:[#allocation2 + $0x1b0] sm:$0xff]  ;;  %v970_v1 = vld [vmem:[#allocation2 + $0x188] sm:$0xff]  ;;  %v969_v2 = vld [vmem:[#allocation2 + $0x180] sm:$0xff] }
 0x105   : > { %v1864_v5 = vmax.f32 %v639_v4, 0.0  ;;  %1540 = vmatprep.subr.mxu0 %v1862_v3  ;;  %v968_v4 = vld [vmem:[#allocation2 + $0x178] sm:$0xff] }
 0x107   : > { %v643_v6 = vadd.f32 %v1862_v3, %v1864_v5 }
 0x109   : > { %v644_v7 = vrot.slane %v643_v6, 4 }
 0x10b   : > { %v645_v8 = vadd.f32 %v644_v7, %v643_v6  ;;  %v967_v6 = vld [vmem:[#allocation2 + $0x170] sm:$0xff]  ;;  %v966_v7 = vld [vmem:[#allocation2 + $0x168] sm:$0xff] }
 0x10d   : > { %v646_v9 = vrot.slane %v645_v8, 2 }
 0x10f   : > { %v647_v10 = vadd.f32 %v646_v9, %v645_v8  ;;  %v965_v8 = vld [vmem:[#allocation2 + $0x160] sm:$0xff]  ;;  %v964_v9 = vld [vmem:[#allocation2 + $0x158] sm:$0xff] }
 0x111   : > { %v648_v11 = vrot.slane %v647_v10, 1 }
 0x113   : > { %v649_v12 = vadd.f32 %v648_v11, %v647_v10  ;;  %v963_v10 = vld [vmem:[#allocation2 + $0x150] sm:$0xff]  ;;  %v962_v11 = vld [vmem:[#allocation2 + $0x148] sm:$0xff] }
 0x115   : > { %1533 = vmatmul.mubr.f32.vlgmr.msra.gmra.mxu1 %v649_v12  ;;  %v961_v12 = vld [vmem:[#allocation2 + $0x140] sm:$0xff] }
 0x116   : > { %1126 = vmatprep.mubr.f32.mxu1 %v1619_v38  ;;  %1063 = vmatpush1.msra.mxu1 %v950_v14  ;;  %v959_v14 = vld [vmem:[#allocation2 + $0x130] sm:$0xff] }
 0x117   : > { %1064 = vmatprep.subr.mxu1 %v949_v15  ;;  %v958_v15 = vld [vmem:[#allocation2 + $0x128] sm:$0xff] }
 0x118   : > { %1065 = vmatpush1.msra.mxu1 %v948_v16  ;;  %v957_v16 = vld [vmem:[#allocation2 + $0x120] sm:$0xff] }
 0x119   : > { %1066 = vmatprep.subr.mxu1 %v947_v17  ;;  %v956_v17 = vld [vmem:[#allocation2 + $0x118] sm:$0xff] }
 0x11a   : > { %1067 = vmatpush1.msra.mxu1 %v946_v18  ;;  %v955_v18 = vld [vmem:[#allocation2 + $0x110] sm:$0xff] }
 0x11b   : > { %1068 = vmatprep.subr.mxu1 %v945_v19  ;;  %v954_v19 = vld [vmem:[#allocation2 + $0x108] sm:$0xff] }
 0x11c   : > { %1069 = vmatpush1.msra.mxu1 %v944_v20  ;;  %v953_v20 = vld [vmem:[#allocation2 + $0x100] sm:$0xff] }
 0x11d   : > { %1070 = vmatprep.subr.mxu1 %v943_v21  ;;  %v1171_v21 = vld [vmem:[#allocation2 + $0x2f8] sm:$0xff] }
 0x11e   : > { %1071 = vmatpush1.msra.mxu1 %v942_v22  ;;  %v1170_v22 = vld [vmem:[#allocation2 + $0x2f0] sm:$0xff] }
 0x11f   : > { %1072 = vmatprep.subr.mxu1 %v941_v23  ;;  %v1169_v23 = vld [vmem:[#allocation2 + $0x2e8] sm:$0xff] }
 0x120   : > { %1073 = vmatpush1.msra.mxu1 %v940_v24  ;;  %v1168_v24 = vld [vmem:[#allocation2 + $0x2e0] sm:$0xff] }
 0x121   : > { %1074 = vmatprep.subr.mxu1 %v939_v25  ;;  %v1167_v25 = vld [vmem:[#allocation2 + $0x2d8] sm:$0xff] }
 0x122   : > { %1075 = vmatpush1.msra.mxu1 %v938_v26  ;;  %v1166_v26 = vld [vmem:[#allocation2 + $0x2d0] sm:$0xff] }
 0x123   : > { %1076 = vmatprep.subr.mxu1 %v937_v27  ;;  %v1165_v27 = vld [vmem:[#allocation2 + $0x2c8] sm:$0xff] }
 0x124   : > { %1077 = vmatpush1.msra.mxu1 %v936_v28  ;;  %v1164_v28 = vld [vmem:[#allocation2 + $0x2c0] sm:$0xff] }
 0x125   : > { %1078 = vmatprep.subr.mxu1 %v935_v29  ;;  %v1163_v29 = vld [vmem:[#allocation2 + $0x2b8] sm:$0xff] }
 0x126   : > { %1079 = vmatpush1.msra.mxu1 %v934_v30  ;;  %v1161_v30 = vld [vmem:[#allocation2 + $0x2a8] sm:$0xff] }
 0x127   : > { %1080 = vmatprep.subr.mxu1 %v933_v31  ;;  %v1160_v31 = vld [vmem:[#allocation2 + $0x2a0] sm:$0xff] }
 0x128   : > { %1081 = vmatpush1.msra.mxu1 %v932_v32  ;;  %v1159_v32 = vld [vmem:[#allocation2 + $0x298] sm:$0xff] }
 0x129   : > { %1082 = vmatprep.subr.mxu1 %v931_v33  ;;  %v1158_v33 = vld [vmem:[#allocation2 + $0x290] sm:$0xff] }
 0x12a   : > { %1083 = vmatpush1.msra.mxu1 %v930_v34  ;;  %v1157_v34 = vld [vmem:[#allocation2 + $0x288] sm:$0xff] }
 0x12b   : > { %1084 = vmatprep.subr.mxu1 %v929_v35  ;;  %v1155_v35 = vld [vmem:[#allocation2 + $0x278] sm:$0xff] }
 0x12c   : > { %1085 = vmatpush1.msra.mxu1 %v928_v36  ;;  %v1154_v36 = vld [vmem:[#allocation2 + $0x270] sm:$0xff] }
 0x12d   : > { %1086 = vmatprep.subr.mxu1 %v927_v37  ;;  %v1153_v37 = vld [vmem:[#allocation2 + $0x268] sm:$0xff] }
 0x1d5   : > { %v733_v40 = vpop.f32.mrf.mxu1 }
 0x1d6   : > { %v734_v41 = vadd.f32 %v733_v40, %v666_v39  ;;  %v1152_v39 = vld [vmem:[#allocation2 + $0x260] sm:$0xff]  ;;  %v1151_v40 = vld [vmem:[#allocation2 + $0x258] sm:$0xff] }
 0x1d7   : > { %v1534_v42 = vpop.f32.mrf.mxu1 }
 0x1d8   : > { %v1379_v43 = vmul.f32 -1.442695, %v734_v41  ;;  %v926_v41 = vld [vmem:[#allocation2 + $0x30] sm:$0xff] }
 0x1d9   : > { %v1150_v42 = vld [vmem:[#allocation2 + $0x250] sm:$0xff]  ;;  %1087 = vmatpush1.msra.mxu1 %v926_v41 }
 0x1da   : > { %1574 = vpow2.f32 %v1379_v43  ;;  %v925_v43 = vld [vmem:[#allocation2 + $0x28] sm:$0xff] }
 0x1db   : > { %1088 = vmatprep.subr.mxu1 %v925_v43 }
 0x1e7   : > { %v1575_v44 = vpop.eup %1574 }
 0x1e8   : > { %v740_v45 = vadd.f32 1.0, %v1575_v44  ;;  %v1149_v44 = vld [vmem:[#allocation2 + $0x248] sm:$0xff] }
 0x1ea   : > { %1576 = vrcp.f32 %v740_v45  ;;  %v924_v45 = vld [vmem:[#allocation2 + $0x20] sm:$0xff] }
 0x1eb   : > { %1089 = vmatpush1.msra.mxu1 %v924_v45 }
 0x1f7   : > { %v1577_v47 = vpop.eup %1576 }
 0x1f8   : > { %1538 = vmatmul.mubr.msk.f32.vlgmr.msra.gmra.mxu0 %vm744_vm4, %v1577_v47  ;;  %v923_v47 = vld [vmem:[#allocation2 + $0x18] sm:$0xff] }
 0x1f9   : > { %1541 = vmatpush3.msra.mxu0 %v1862_v3  ;;  %1544 = vmatprep.mubr.msk.f32.mxu0 %vm822_vm5, %v818_v46  ;;  %v1148_v46 = vld [vmem:[#allocation2 + $0x240] sm:$0xff] }
 0x1fa   : > { %1542 = vmatprep.subr.mxu0 %v1864_v5  ;;  %1090 = vmatprep.subr.mxu1 %v923_v47 }
 0x1fb   : > { %1543 = vmatpush3.msra.mxu0 %v1864_v5 }
 0x1fc   : > { %985 = vmatprep.subr.mxu0 %v984_v48  ;;  %1545 = vmatmul.mubr.msk.f32.vlgmr.msra.gmra.mxu0 %vm822_vm5, %v819_v49  ;;  %v1147_v48 = vld [vmem:[#allocation2 + $0x238] sm:$0xff]  ;;  %v922_v49 = vld [vmem:[#allocation2 + $0x10] sm:$0xff] }
 0x1fd   : > { %986 = vmatpush1.msra.mxu0 %v983_v50  ;;  %1547 = vmatprep.mubr.msk.f32.mxu0 %vm822_vm5, %v820_v51  ;;  %v1146_v50 = vld [vmem:[#allocation2 + $0x230] sm:$0xff]  ;;  %v921_v51 = vld [vmem:[#allocation2 + $0x8] sm:$0xff] }
 0x1fe   : > { %987 = vmatprep.subr.mxu0 %v982_v52  ;;  %1091 = vmatpush1.msra.mxu1 %v922_v49  ;;  %v1145_v52 = vld [vmem:[#allocation2 + $0x228] sm:$0xff] }
 0x1ff   : > { %988 = vmatpush1.msra.mxu0 %v981_v53  ;;  %1092 = vmatprep.subr.mxu1 %v921_v51  ;;  %v920_v53 = vld [vmem:[#allocation2] sm:$0xff] }
 0x200   : > { %989 = vmatprep.subr.mxu0 %v980_v54  ;;  %1548 = vmatmul.mubr.msk.f32.gmra.mxu0 %vm822_vm5, %v821_v55  ;;  %v1144_v54 = vld [vmem:[#allocation2 + $0x220] sm:$0xff]  ;;  %v1143_v55 = vld [vmem:[#allocation2 + $0x218] sm:$0xff] }
 0x201   : > { %990 = vmatpush1.msra.mxu0 %v979_v56  ;;  %1049 = vmatprep.mubr.f32.mxu0 %v1619_v38  ;;  %v1142_v56 = vld [vmem:[#allocation2 + $0x210] sm:$0xff] }
 0x202   : > { %991 = vmatprep.subr.mxu0 %v978_v57  ;;  %1093 = vmatpush1.msra.mxu1 %v920_v53  ;;  %v1141_v57 = vld [vmem:[#allocation2 + $0x208] sm:$0xff] }
 0x203   : > { %992 = vmatpush1.msra.mxu0 %v977_v58  ;;  %v1140_v58 = vld [vmem:[#allocation2 + $0x200] sm:$0xff] }
 0x204   : > { %993 = vmatprep.subr.mxu0 %v976_v59 }
 0x205   : > { %994 = vmatpush1.msra.mxu0 %v975_v60 }
 0x206   : > { %995 = vmatprep.subr.mxu0 %v974_v61 }
 0x207   : > { %996 = vmatpush1.msra.mxu0 %v973_v62 }
 0x208   : > { %997 = vmatprep.subr.mxu0 %v972_v63 }
 0x209   : > { %998 = vmatpush1.msra.mxu0 %v971_v0 }
 0x20a   : > { %999 = vmatprep.subr.mxu0 %v970_v1 }
 0x20b   : > { %1000 = vmatpush1.msra.mxu0 %v969_v2  ;;  %v1255_v2 = vlaneseq }
 0x20c   : > { %1001 = vmatprep.subr.mxu0 %v968_v4 }
 0x20d   : > { %1002 = vmatpush1.msra.mxu0 %v967_v6  ;;  %v1256_v6 = vshrl.u32 %v1255_v2, 7 }
 0x20e   : > { %1003 = vmatprep.subr.mxu0 %v966_v7 }
 0x20f   : > { %1004 = vmatpush1.msra.mxu0 %v965_v8 }
 0x210   : > { %1005 = vmatprep.subr.mxu0 %v964_v9  ;;  %v1253_v9 = vld [vmem:[%s1913_s4] sm:$0x3] }
 0x211   : > { %1006 = vmatpush1.msra.mxu0 %v963_v10  ;;  %v1257_v10 = vsub.s32 0, %v1256_v6 }
 0x212   : > { %1007 = vmatprep.subr.mxu0 %v962_v11  ;;  %v1261_v11 = vsub.s32 1, %v1256_v6 }
 0x213   : > { %1008 = vmatpush1.msra.mxu0 %v961_v12 }
 0x214   : > { %1009 = vmatprep.subr.mxu0 %v960_v13 }
 0x215   : > { %1010 = vmatpush1.msra.mxu0 %v959_v14 }
 0x216   : > { %1011 = vmatprep.subr.mxu0 %v958_v15  ;;  %v1258_v15 = vrot.slane %v1253_v9, %v1257_v10 }
 0x217   : > { %1012 = vmatpush1.msra.mxu0 %v957_v16 }
 0x218   : > { %1013 = vmatprep.subr.mxu0 %v956_v17 }
 0x219   : > { %1014 = vmatpush1.msra.mxu0 %v955_v18 }
 0x21a   : > { %1015 = vmatprep.subr.mxu0 %v954_v19  ;;  %v1262_v19 = vrot.slane %v1253_v9, %v1261_v11 }
 0x21b   : > { %1016 = vmatpush1.msra.mxu0 %v953_v20 }
 0x21c   : > { %1050 = vmatmul.mubr.f32.vlgmr.msra.gmra.mxu0 %v1864_v5  ;;  %1172 = vmatprep.subr.mxu0 %v1171_v21  ;;  %v1162_v5 = vld [vmem:[#allocation2 + $0x2b0] sm:$0xff] }
 0x21d   : > { %1055 = vmatprep.mubr.f32.mxu0 %v1619_v38  ;;  %1173 = vmatpush1.msra.mxu0 %v1170_v22 }
 0x21e   : > { %1174 = vmatprep.subr.mxu0 %v1169_v23 }
 0x21f   : > { %1175 = vmatpush1.msra.mxu0 %v1168_v24 }
 0x220   : > { %1056 = vmatmul.mubr.f32.gmra.mxu0 %v1862_v3  ;;  %1176 = vmatprep.subr.mxu0 %v1167_v25  ;;  %v1156_v3 = vld [vmem:[#allocation2 + $0x280] sm:$0xff] }
 0x221   : > { %1177 = vmatpush1.msra.mxu0 %v1166_v26  ;;  %1236 = vmatprep.mubr.f32.mxu0 %v1619_v38 }
 0x222   : > { %1178 = vmatprep.subr.mxu0 %v1165_v27 }
 0x223   : > { %1179 = vmatpush1.msra.mxu0 %v1164_v28 }
 0x224   : > { %1180 = vmatprep.subr.mxu0 %v1163_v29 }
 0x225   : > { %1181 = vmatpush1.msra.mxu0 %v1162_v5 }
 0x226   : > { %1182 = vmatprep.subr.mxu0 %v1161_v30 }
 0x227   : > { %1183 = vmatpush1.msra.mxu0 %v1160_v31 }
 0x228   : > { %1184 = vmatprep.subr.mxu0 %v1159_v32 }
 0x229   : > { %1185 = vmatpush1.msra.mxu0 %v1158_v33 }
 0x22a   : > { %1186 = vmatprep.subr.mxu0 %v1157_v34 }
 0x22b   : > { %1187 = vmatpush1.msra.mxu0 %v1156_v3 }
 0x22c   : > { %1188 = vmatprep.subr.mxu0 %v1155_v35 }
 0x22d   : > { %1189 = vmatpush1.msra.mxu0 %v1154_v36 }
 0x22e   : > { %1190 = vmatprep.subr.mxu0 %v1153_v37 }
 0x22f   : > { %1191 = vmatpush1.msra.mxu0 %v1152_v39 }
 0x230   : > { %1192 = vmatprep.subr.mxu0 %v1151_v40 }
 0x231   : > { %1193 = vmatpush1.msra.mxu0 %v1150_v42 }
 0x232   : > { %1194 = vmatprep.subr.mxu0 %v1149_v44 }
 0x233   : > { %1195 = vmatpush1.msra.mxu0 %v1148_v46 }
 0x234   : > { %1196 = vmatprep.subr.mxu0 %v1147_v48 }
 0x235   : > { %1197 = vmatpush1.msra.mxu0 %v1146_v50 }
 0x236   : > { %1198 = vmatprep.subr.mxu0 %v1145_v52 }
 0x237   : > { %1199 = vmatpush1.msra.mxu0 %v1144_v54 }
 0x238   : > { %1200 = vmatprep.subr.mxu0 %v1143_v55 }
 0x239   : > { %1201 = vmatpush1.msra.mxu0 %v1142_v56 }
 0x23a   : > { %1202 = vmatprep.subr.mxu0 %v1141_v57 }
 0x23b   : > { %1203 = vmatpush1.msra.mxu0 %v1140_v58 }
 0x2b8   : > { %v814_v59 = vpop.f32.mrf.mxu0 }
 0x2b9   : > { %v1272_v22 = vrot.slane %v814_v59, %v1257_v10 }
 0x2ba   : > { %v1539_v60 = vpop.f32.mrf.mxu0 }
 0x2bc   : > { %v1546_v61 = vpop.f32.mrf.mxu0 }
 0x2be   : > { %v901_v62 = vpop.f32.mrf.mxu0 }
 0x2bf   : > { %1127 = vmatmul.mubr.f32.vlgmr.msra.gmra.mxu1 %v901_v62 }
 0x2c0   : > { %v1549_v63 = vpop.f32.mrf.mxu0  ;;  %1132 = vmatprep.mubr.f32.mxu1 %v1619_v38 }
 0x2c2   : > { %v911_v0 = vpop.f32.mrf.mxu0 }
 0x2c3   : > { %1133 = vmatmul.mubr.f32.gmra.mxu1 %v1546_v61  ;;  %1237 = vmatmul.mubr.f32.vlgmr.msra.gmra.mxu0 %v911_v0 }
 0x2c4   : > { %1242 = vmatprep.mubr.f32.mxu0 %v1619_v38 }
 0x2c7   : > { %1243 = vmatmul.mubr.f32.gmra.mxu0 %v1549_v63 }
 0x2dc   : > { %v1051_v1 = vpop.f32.mrf.mxu0 }
 0x2de   : > { %v1053_v4 = vpop.f32.mrf.mxu0 }
 0x2e0   : > { %v1057_v7 = vpop.f32.mrf.mxu0 }
 0x2e2   : > { %v1059_v12 = vpop.f32.mrf.mxu0 }
 0x37f   : > { %v1128_v8 = vpop.f32.mrf.mxu1 }
 0x380   : > { %v1129_v14 = vadd.f32 %v1128_v8, %v1051_v1 }
 0x381   : > { %v1130_v13 = vpop.f32.mrf.mxu1 }
 0x382   : > { %v1131_v17 = vadd.f32 %v1130_v13, %v1053_v4 }
 0x383   : > { %v1134_v16 = vpop.f32.mrf.mxu1  ;;  %v1238_v38 = vpop.f32.mrf.mxu0 }
 0x384   : > { %v1249_v18 = vadd.f32 %v1238_v38, %v1129_v14  ;;  %v1135_v23 = vadd.f32 %v1134_v16, %v1057_v7 }
 0x385   : > { %v1136_v20 = vpop.f32.mrf.mxu1  ;;  %v1240_v21 = vpop.f32.mrf.mxu0 }
 0x386   : > { %v1265_v24 = vadd.f32 %v1258_v15, %v1249_v18  ;;  %v1250_v25 = vadd.f32 %v1240_v21, %v1131_v17  ;;  %v1137_v28 = vadd.f32 %v1136_v20, %v1059_v12 }
 0x387   : > { %v1244_v26 = vpop.f32.mrf.mxu0 }
 0x388   : > { %v1273_v27 = vmul.f32 %v1272_v22, %v1265_v24  ;;  %v1266_v29 = vadd.f32 %v1262_v19, %v1250_v25  ;;  %v1251_v5 = vadd.f32 %v1244_v26, %v1135_v23 }
 0x389   : > { %v1246_v30 = vpop.f32.mrf.mxu0 }
 0x38a   : > { %v1275_v31 = vadd.f32 %v1273_v27, %v1266_v29  ;;  %v1267_v32 = vadd.f32 %v1258_v15, %v1251_v5  ;;  %v1252_v33 = vadd.f32 %v1246_v30, %v1137_v28 }
 0x38c   : > { %1277 = vst [vmem:[%s347_s27] sm:$0xff] %v1275_v31  ;;  %v1274_v34 = vmul.f32 %v1272_v22, %v1267_v32  ;;  %v1268_v3 = vadd.f32 %v1262_v19, %v1252_v33 }
 0x38e   : > { %v1276_v35 = vadd.f32 %v1274_v34, %v1268_v3 }
 0x390   : > { %1278 = vst [vmem:[%s347_s27 + $0x8] sm:$0xff] %v1276_v35 }
 0x391 PF: > { %s20_s30 = sadd.s32 1, %s1614_s30  }
 0x392   : > { %p17_p1 = scmp.ge.s32.totalorder %s20_s30, 4  }
 0x394   :  { %19 = sbr.rel (!%p17_p1) target bundleno = 1 (0x1), region = 95 }
 0x399   :  { %1300 = vsyncpa [#allocation3], 1 }
 0x39a   :  { %1302 = vsyncpa [#allocation3 + $0x1], 1 }

</bundles_post_ra>
